<compile_context>
chip_gen: v6e
topology: v6e:2x2x1
jax: 0.10.0
libtpu: 0.0.40
codegen_flags: <defaults>
</compile_context>

<pallas_src>
import functools

import jax
import jax.numpy as jnp
from jax import lax
from jax.experimental import pallas as pl
from jax.experimental.pallas import tpu as pltpu

_LANE = 128                       # keep output last dim lane-dense
_VMEM_BUDGET = 40 * 1024 * 1024   # target for double-buffered working set
_VMEM_LIMIT = 48 * 1024 * 1024    # < 64 MiB physical VMEM on v7x


def _round_up(x, m):
    return ((x + m - 1) // m) * m


def _sublane_multiple(dtype):
    # 8 rows for 32-bit, 16 for 16-bit, 32 for 8-bit dtypes.
    return 8 * max(1, 4 // jnp.dtype(dtype).itemsize)


def _pad_last(x, multiple, value=0):
    size = x.shape[-1]
    pad = (-size) % multiple
    if pad == 0:
        return x                                # no HBM round trip when aligned
    widths = [(0, 0)] * (x.ndim - 1) + [(0, pad)]
    return jnp.pad(x, widths, constant_values=value)


# --------------------------------------------------------------------------
# Kernels
# --------------------------------------------------------------------------

def _gather_dim1_kernel(x_ref, idx_ref, o_ref, *, n_valid):
    # x_ref:   (tm, Np)        tensor row-tile (Np <= 128 on this path)
    # idx_ref: (tm, Kp) int32  indices in [0, n_valid)
    # o_ref:   (tm, Kp)        out[m, k] = x[m, idx[m, k]]
    x = x_ref[...]
    if jnp.issubdtype(x.dtype, jnp.floating) and x.dtype.itemsize == 2:
        x = x.astype(jnp.float32)   # one cast per tile (v5e has no bf16 VALU)
    idx = idx_ref[...]
    acc = jnp.zeros(idx.shape, dtype=x.dtype)
    # Small candidate axis (n_valid <= 128): static unroll of compare+select.
    for n in range(n_valid):
        acc = jnp.where(idx == n, x[:, n:n + 1], acc)
    o_ref[...] = acc.astype(o_ref.dtype)


def _gather_dim0_kernel(x_ref, idx_ref, o_ref, *, chunk, unroll):
    # Grid: (output row tiles [parallel], candidate-row chunks [arbitrary]).
    # x_ref:   (chunk, Np)     candidate rows of this chunk
    # idx_ref: (tk, Np) int32  indices in [0, M)
    # o_ref:   (tk, Np)        out[k, n] = x[idx[k, n], n]  (resident accumulator)
    c = pl.program_id(1)

    @pl.when(c == 0)
    def _():
        o_ref[...] = jnp.zeros_like(o_ref)

    idx = idx_ref[...]
    base = c * chunk

    def body(j, acc):
        # Size-1 dynamic sublane load; broadcasting select replicates it
        # across the tile's sublanes (replicated layout, cheap).
        row = x_ref[pl.ds(j, 1), :]                 # (1, Np)
        return jnp.where(idx == base + j, row, acc)

    o_ref[...] = lax.fori_loop(0, chunk, body, o_ref[...], unroll=unroll)


# --------------------------------------------------------------------------
# Wrapper
# --------------------------------------------------------------------------

class GatherPallas:
    """Pallas equivalent of GatherModule(dimension) for 2-D inputs."""

    def __init__(self, dimension, row_tile=512, m_chunk=256, dim1_direct_max=128):
        assert dimension in (0, 1), "only 2-D gather (dim 0 or 1) implemented"
        self.dimension = dimension
        self.row_tile = row_tile          # output rows per grid step
        self.m_chunk = m_chunk            # candidate rows per chunk (dim=0 kernel)
        self.dim1_direct_max = dim1_direct_max

    def __call__(self, tensor, index):
        assert tensor.ndim == 2 and index.ndim == 2
        index = index.astype(jnp.int32)
        if self.dimension == 1:
            M, N = tensor.shape
            Mi, _ = index.shape
            assert Mi <= M, "index.shape[0] must be <= tensor.shape[0] for dim=1"
            x = tensor[:Mi] if Mi < M else tensor
            if N <= self.dim1_direct_max:
                return self._dim1_direct(x, index)
            # Large candidate axis: dim=1 gather == dim=0 gather on transposed
            # operands; the inner loop is then sublane-broadcast (VPU) work
            # instead of N XLU lane broadcasts.
            return self._dim0(x.T, index.T).T
        else:
            _, N = tensor.shape
            _, Ni = index.shape
            assert Ni <= N, "index.shape[1] must be <= tensor.shape[1] for dim=0"
            x = tensor[:, :Ni] if Ni < N else tensor
            return self._dim0(x, index)

    # dim == 1 (small N): out[m, k] = x[m, idx[m, k]]
    def _dim1_direct(self, x, idx):
        M, N = x.shape
        _, K = idx.shape
        sub = _sublane_multiple(x.dtype)
        xp = _pad_last(x, _LANE)                   # (M, Np)
        ip = _pad_last(idx, _LANE)                 # (M, Kp)
        Np, Kp = xp.shape[1], ip.shape[1]
        isz = xp.dtype.itemsize

        tm = min(_round_up(self.row_tile, sub), _round_up(M, sub))
        while 2 * (tm * Np * isz + tm * Kp * 4 + tm * Kp * isz) > _VMEM_BUDGET \
                and tm > sub:
            tm = max(sub, tm // 2)

        out = pl.pallas_call(
            functools.partial(_gather_dim1_kernel, n_valid=N),
            out_shape=jax.ShapeDtypeStruct((M, Kp), x.dtype),
            grid=(pl.cdiv(M, tm),),
            in_specs=[
                pl.BlockSpec((tm, Np), lambda i: (i, 0)),
                pl.BlockSpec((tm, Kp), lambda i: (i, 0)),
            ],
            out_specs=pl.BlockSpec((tm, Kp), lambda i: (i, 0)),
            compiler_params=pltpu.CompilerParams(
                dimension_semantics=("parallel",),
                vmem_limit_bytes=_VMEM_LIMIT),
            cost_estimate=pl.CostEstimate(
                flops=2 * M * Kp * N,
                transcendentals=0,
                bytes_accessed=xp.size * isz + ip.size * 4 + M * Kp * isz),
        )(xp, ip)
        return out[:, :K]

    # dim == 0: out[k, n] = x[idx[k, n], n]
    def _dim0(self, x, idx):
        M, N = x.shape
        K, _ = idx.shape
        sub = _sublane_multiple(x.dtype)
        xp = _pad_last(x, _LANE)                   # (M, Np)
        ip = _pad_last(idx, _LANE)                 # (K, Np)
        Np = xp.shape[1]
        isz = xp.dtype.itemsize

        tk = min(_round_up(self.row_tile, sub), _round_up(K, sub))
        mc = min(_round_up(self.m_chunk, sub), _round_up(M, sub))
        while 2 * (mc * Np * isz + tk * Np * 4 + tk * Np * isz) > _VMEM_BUDGET \
                and (tk > sub or mc > sub):
            if mc >= tk and mc > sub:
                mc = max(sub, mc // 2)
            else:
                tk = max(sub, tk // 2)

        n_row_tiles = pl.cdiv(K, tk)
        out = pl.pallas_call(
            functools.partial(_gather_dim0_kernel, chunk=mc, unroll=min(8, mc)),
            out_shape=jax.ShapeDtypeStruct((K, Np), x.dtype),
            grid=(n_row_tiles, pl.cdiv(M, mc)),    # reduction-like axis last
            in_specs=[
                pl.BlockSpec((mc, Np), lambda i, c: (c, 0)),   # candidate chunk
                pl.BlockSpec((tk, Np), lambda i, c: (i, 0)),   # index row tile
            ],
            out_specs=pl.BlockSpec((tk, Np), lambda i, c: (i, 0)),  # resident
            compiler_params=pltpu.CompilerParams(
                dimension_semantics=("parallel", "arbitrary"),
                vmem_limit_bytes=_VMEM_LIMIT),
            cost_estimate=pl.CostEstimate(
                flops=2 * K * Np * M,
                transcendentals=0,
                bytes_accessed=xp.size * isz * n_row_tiles
                + ip.size * 4 + K * Np * isz),
        )(xp, ip)
        return out[:, :N]


def _reference_gather(tensor, index, dim):
    return jnp.take_along_axis(tensor, index, axis=dim)


if __name__ == "__main__":
    key = jax.random.PRNGKey(0)
    k1, k2, k3, k4, k5, k6 = jax.random.split(key, 6)

    M, N, K = 8, 32, 16
    x = jax.random.normal(k1, (M, N), dtype=jnp.float32)

    # dim = 1 gather (small-N direct path): index (M, K), values in [0, N)
    idx1 = jax.random.randint(k2, (M, K), 0, N, dtype=jnp.int32)
    mod1 = GatherPallas(dimension=1)
    out1 = jax.block_until_ready(mod1(x, idx1))
    assert out1.shape == idx1.shape
    assert jnp.allclose(out1, _reference_gather(x, idx1, 1)), "dim=1 mismatch"

    # dim = 1 with index smaller along dim 0 (torch-allowed relaxed shape)
    idx1s = jax.random.randint(k3, (6, K), 0, N, dtype=jnp.int32)
    out1s = jax.block_until_ready(mod1(x, idx1s))
    assert out1s.shape == idx1s.shape
    assert jnp.allclose(out1s, _reference_gather(x[:6], idx1s, 1)), "dim=1 small-index mismatch"

    # dim = 1 with a large candidate axis (exercises transpose -> dim0 route)
    x2 = jax.random.normal(k4, (M, 192), dtype=jnp.float32)
    idx2 = jax.random.randint(k5, (M, K), 0, 192, dtype=jnp.int32)
    out2 = jax.block_until_ready(mod1(x2, idx2))
    assert out2.shape == idx2.shape
    assert jnp.allclose(out2, _reference_gather(x2, idx2, 1)), "dim=1 large-N mismatch"

    # dim = 0 gather: index (6, N), values in [0, M)
    idx0 = jax.random.randint(k6, (6, N), 0, M, dtype=jnp.int32)
    mod0 = GatherPallas(dimension=0)
    out0 = jax.block_until_ready(mod0(x, idx0))
    assert out0.shape == idx0.shape
    assert jnp.allclose(out0, _reference_gather(x, idx0, 0)), "dim=0 mismatch"

    # dim = 0 with index smaller along dim 1 (torch-allowed relaxed shape)
    idx0s = idx0[:, :20]
    out0s = jax.block_until_ready(mod0(x, idx0s))
    assert out0s.shape == idx0s.shape
    assert jnp.allclose(out0s, _reference_gather(x[:, :20], idx0s, 0)), "dim=0 small-index mismatch"

    print("KERNEL_OK")
</pallas_src>

<mosaic_0001>
module attributes {stable_mosaic.version = 11 : i64} {
  func.func @_gather_dim1_kernel(%arg0: i32, %arg1: memref<8x128xf32, #tpu.memory_space<vmem>>, %arg2: memref<8x128xi32, #tpu.memory_space<vmem>>, %arg3: memref<8x128xf32, #tpu.memory_space<vmem>>) attributes {dimension_semantics = [#tpu.dimension_semantics<parallel>], iteration_bounds = array<i64: 1>, scalar_prefetch = 0 : i64, scratch_operands = 0 : i64, tpu.core_type = #tpu.core_type<tc>, window_params = [{transform_indices = @transform_0, window_bounds = array<i64: 8, 128>}, {transform_indices = @transform_1, window_bounds = array<i64: 8, 128>}, {transform_indices = @transform_2, window_bounds = array<i64: 8, 128>}]} {
    %c0 = arith.constant 0 : index
    %c0_0 = arith.constant 0 : index
    %0 = vector.load %arg1[%c0, %c0_0] : memref<8x128xf32, #tpu.memory_space<vmem>>, vector<8x128xf32>
    %c0_1 = arith.constant 0 : index
    %c0_2 = arith.constant 0 : index
    %1 = vector.load %arg2[%c0_1, %c0_2] : memref<8x128xi32, #tpu.memory_space<vmem>>, vector<8x128xi32>
    %cst = arith.constant 0.000000e+00 : f32
    %2 = vector.broadcast %cst : f32 to vector<8x128xf32>
    %c0_i32 = arith.constant 0 : i32
    %3 = vector.broadcast %c0_i32 : i32 to vector<8x128xi32>
    %4 = arith.cmpi eq, %1, %3 : vector<8x128xi32>
    %5 = vector.extract_strided_slice %0 {offsets = [0, 0], sizes = [8, 1], strides = [1, 1]} : vector<8x128xf32> to vector<8x1xf32>
    %6 = vector.shape_cast %5 : vector<8x1xf32> to vector<8x1xf32>
    %7 = vector.broadcast %6 : vector<8x1xf32> to vector<8x128xf32>
    %8 = arith.select %4, %7, %2 : vector<8x128xi1>, vector<8x128xf32>
    %c1_i32 = arith.constant 1 : i32
    %9 = vector.broadcast %c1_i32 : i32 to vector<8x128xi32>
    %10 = arith.cmpi eq, %1, %9 : vector<8x128xi32>
    %11 = vector.extract_strided_slice %0 {offsets = [0, 1], sizes = [8, 1], strides = [1, 1]} : vector<8x128xf32> to vector<8x1xf32>
    %12 = vector.shape_cast %11 : vector<8x1xf32> to vector<8x1xf32>
    %13 = vector.broadcast %12 : vector<8x1xf32> to vector<8x128xf32>
    %14 = arith.select %10, %13, %8 : vector<8x128xi1>, vector<8x128xf32>
    %c2_i32 = arith.constant 2 : i32
    %15 = vector.broadcast %c2_i32 : i32 to vector<8x128xi32>
    %16 = arith.cmpi eq, %1, %15 : vector<8x128xi32>
    %17 = vector.extract_strided_slice %0 {offsets = [0, 2], sizes = [8, 1], strides = [1, 1]} : vector<8x128xf32> to vector<8x1xf32>
    %18 = vector.shape_cast %17 : vector<8x1xf32> to vector<8x1xf32>
    %19 = vector.broadcast %18 : vector<8x1xf32> to vector<8x128xf32>
    %20 = arith.select %16, %19, %14 : vector<8x128xi1>, vector<8x128xf32>
    %c3_i32 = arith.constant 3 : i32
    %21 = vector.broadcast %c3_i32 : i32 to vector<8x128xi32>
    %22 = arith.cmpi eq, %1, %21 : vector<8x128xi32>
    %23 = vector.extract_strided_slice %0 {offsets = [0, 3], sizes = [8, 1], strides = [1, 1]} : vector<8x128xf32> to vector<8x1xf32>
    %24 = vector.shape_cast %23 : vector<8x1xf32> to vector<8x1xf32>
    %25 = vector.broadcast %24 : vector<8x1xf32> to vector<8x128xf32>
    %26 = arith.select %22, %25, %20 : vector<8x128xi1>, vector<8x128xf32>
    %c4_i32 = arith.constant 4 : i32
    %27 = vector.broadcast %c4_i32 : i32 to vector<8x128xi32>
    %28 = arith.cmpi eq, %1, %27 : vector<8x128xi32>
    %29 = vector.extract_strided_slice %0 {offsets = [0, 4], sizes = [8, 1], strides = [1, 1]} : vector<8x128xf32> to vector<8x1xf32>
    %30 = vector.shape_cast %29 : vector<8x1xf32> to vector<8x1xf32>
    %31 = vector.broadcast %30 : vector<8x1xf32> to vector<8x128xf32>
    %32 = arith.select %28, %31, %26 : vector<8x128xi1>, vector<8x128xf32>
    %c5_i32 = arith.constant 5 : i32
    %33 = vector.broadcast %c5_i32 : i32 to vector<8x128xi32>
    %34 = arith.cmpi eq, %1, %33 : vector<8x128xi32>
    %35 = vector.extract_strided_slice %0 {offsets = [0, 5], sizes = [8, 1], strides = [1, 1]} : vector<8x128xf32> to vector<8x1xf32>
    %36 = vector.shape_cast %35 : vector<8x1xf32> to vector<8x1xf32>
    %37 = vector.broadcast %36 : vector<8x1xf32> to vector<8x128xf32>
    %38 = arith.select %34, %37, %32 : vector<8x128xi1>, vector<8x128xf32>
    %c6_i32 = arith.constant 6 : i32
    %39 = vector.broadcast %c6_i32 : i32 to vector<8x128xi32>
    %40 = arith.cmpi eq, %1, %39 : vector<8x128xi32>
    %41 = vector.extract_strided_slice %0 {offsets = [0, 6], sizes = [8, 1], strides = [1, 1]} : vector<8x128xf32> to vector<8x1xf32>
    %42 = vector.shape_cast %41 : vector<8x1xf32> to vector<8x1xf32>
    %43 = vector.broadcast %42 : vector<8x1xf32> to vector<8x128xf32>
    %44 = arith.select %40, %43, %38 : vector<8x128xi1>, vector<8x128xf32>
    %c7_i32 = arith.constant 7 : i32
    %45 = vector.broadcast %c7_i32 : i32 to vector<8x128xi32>
    %46 = arith.cmpi eq, %1, %45 : vector<8x128xi32>
    %47 = vector.extract_strided_slice %0 {offsets = [0, 7], sizes = [8, 1], strides = [1, 1]} : vector<8x128xf32> to vector<8x1xf32>
    %48 = vector.shape_cast %47 : vector<8x1xf32> to vector<8x1xf32>
    %49 = vector.broadcast %48 : vector<8x1xf32> to vector<8x128xf32>
    %50 = arith.select %46, %49, %44 : vector<8x128xi1>, vector<8x128xf32>
    %c8_i32 = arith.constant 8 : i32
    %51 = vector.broadcast %c8_i32 : i32 to vector<8x128xi32>
    %52 = arith.cmpi eq, %1, %51 : vector<8x128xi32>
    %53 = vector.extract_strided_slice %0 {offsets = [0, 8], sizes = [8, 1], strides = [1, 1]} : vector<8x128xf32> to vector<8x1xf32>
    %54 = vector.shape_cast %53 : vector<8x1xf32> to vector<8x1xf32>
    %55 = vector.broadcast %54 : vector<8x1xf32> to vector<8x128xf32>
    %56 = arith.select %52, %55, %50 : vector<8x128xi1>, vector<8x128xf32>
    %c9_i32 = arith.constant 9 : i32
    %57 = vector.broadcast %c9_i32 : i32 to vector<8x128xi32>
    %58 = arith.cmpi eq, %1, %57 : vector<8x128xi32>
    %59 = vector.extract_strided_slice %0 {offsets = [0, 9], sizes = [8, 1], strides = [1, 1]} : vector<8x128xf32> to vector<8x1xf32>
    %60 = vector.shape_cast %59 : vector<8x1xf32> to vector<8x1xf32>
    %61 = vector.broadcast %60 : vector<8x1xf32> to vector<8x128xf32>
    %62 = arith.select %58, %61, %56 : vector<8x128xi1>, vector<8x128xf32>
    %c10_i32 = arith.constant 10 : i32
    %63 = vector.broadcast %c10_i32 : i32 to vector<8x128xi32>
    %64 = arith.cmpi eq, %1, %63 : vector<8x128xi32>
    %65 = vector.extract_strided_slice %0 {offsets = [0, 10], sizes = [8, 1], strides = [1, 1]} : vector<8x128xf32> to vector<8x1xf32>
    %66 = vector.shape_cast %65 : vector<8x1xf32> to vector<8x1xf32>
    %67 = vector.broadcast %66 : vector<8x1xf32> to vector<8x128xf32>
    %68 = arith.select %64, %67, %62 : vector<8x128xi1>, vector<8x128xf32>
    %c11_i32 = arith.constant 11 : i32
    %69 = vector.broadcast %c11_i32 : i32 to vector<8x128xi32>
    %70 = arith.cmpi eq, %1, %69 : vector<8x128xi32>
    %71 = vector.extract_strided_slice %0 {offsets = [0, 11], sizes = [8, 1], strides = [1, 1]} : vector<8x128xf32> to vector<8x1xf32>
    %72 = vector.shape_cast %71 : vector<8x1xf32> to vector<8x1xf32>
    %73 = vector.broadcast %72 : vector<8x1xf32> to vector<8x128xf32>
    %74 = arith.select %70, %73, %68 : vector<8x128xi1>, vector<8x128xf32>
    %c12_i32 = arith.constant 12 : i32
    %75 = vector.broadcast %c12_i32 : i32 to vector<8x128xi32>
    %76 = arith.cmpi eq, %1, %75 : vector<8x128xi32>
    %77 = vector.extract_strided_slice %0 {offsets = [0, 12], sizes = [8, 1], strides = [1, 1]} : vector<8x128xf32> to vector<8x1xf32>
    %78 = vector.shape_cast %77 : vector<8x1xf32> to vector<8x1xf32>
    %79 = vector.broadcast %78 : vector<8x1xf32> to vector<8x128xf32>
    %80 = arith.select %76, %79, %74 : vector<8x128xi1>, vector<8x128xf32>
    %c13_i32 = arith.constant 13 : i32
    %81 = vector.broadcast %c13_i32 : i32 to vector<8x128xi32>
    %82 = arith.cmpi eq, %1, %81 : vector<8x128xi32>
    %83 = vector.extract_strided_slice %0 {offsets = [0, 13], sizes = [8, 1], strides = [1, 1]} : vector<8x128xf32> to vector<8x1xf32>
    %84 = vector.shape_cast %83 : vector<8x1xf32> to vector<8x1xf32>
    %85 = vector.broadcast %84 : vector<8x1xf32> to vector<8x128xf32>
    %86 = arith.select %82, %85, %80 : vector<8x128xi1>, vector<8x128xf32>
    %c14_i32 = arith.constant 14 : i32
    %87 = vector.broadcast %c14_i32 : i32 to vector<8x128xi32>
    %88 = arith.cmpi eq, %1, %87 : vector<8x128xi32>
    %89 = vector.extract_strided_slice %0 {offsets = [0, 14], sizes = [8, 1], strides = [1, 1]} : vector<8x128xf32> to vector<8x1xf32>
    %90 = vector.shape_cast %89 : vector<8x1xf32> to vector<8x1xf32>
    %91 = vector.broadcast %90 : vector<8x1xf32> to vector<8x128xf32>
    %92 = arith.select %88, %91, %86 : vector<8x128xi1>, vector<8x128xf32>
    %c15_i32 = arith.constant 15 : i32
    %93 = vector.broadcast %c15_i32 : i32 to vector<8x128xi32>
    %94 = arith.cmpi eq, %1, %93 : vector<8x128xi32>
    %95 = vector.extract_strided_slice %0 {offsets = [0, 15], sizes = [8, 1], strides = [1, 1]} : vector<8x128xf32> to vector<8x1xf32>
    %96 = vector.shape_cast %95 : vector<8x1xf32> to vector<8x1xf32>
    %97 = vector.broadcast %96 : vector<8x1xf32> to vector<8x128xf32>
    %98 = arith.select %94, %97, %92 : vector<8x128xi1>, vector<8x128xf32>
    %c16_i32 = arith.constant 16 : i32
    %99 = vector.broadcast %c16_i32 : i32 to vector<8x128xi32>
    %100 = arith.cmpi eq, %1, %99 : vector<8x128xi32>
    %101 = vector.extract_strided_slice %0 {offsets = [0, 16], sizes = [8, 1], strides = [1, 1]} : vector<8x128xf32> to vector<8x1xf32>
    %102 = vector.shape_cast %101 : vector<8x1xf32> to vector<8x1xf32>
    %103 = vector.broadcast %102 : vector<8x1xf32> to vector<8x128xf32>
    %104 = arith.select %100, %103, %98 : vector<8x128xi1>, vector<8x128xf32>
    %c17_i32 = arith.constant 17 : i32
    %105 = vector.broadcast %c17_i32 : i32 to vector<8x128xi32>
    %106 = arith.cmpi eq, %1, %105 : vector<8x128xi32>
    %107 = vector.extract_strided_slice %0 {offsets = [0, 17], sizes = [8, 1], strides = [1, 1]} : vector<8x128xf32> to vector<8x1xf32>
    %108 = vector.shape_cast %107 : vector<8x1xf32> to vector<8x1xf32>
    %109 = vector.broadcast %108 : vector<8x1xf32> to vector<8x128xf32>
    %110 = arith.select %106, %109, %104 : vector<8x128xi1>, vector<8x128xf32>
    %c18_i32 = arith.constant 18 : i32
    %111 = vector.broadcast %c18_i32 : i32 to vector<8x128xi32>
    %112 = arith.cmpi eq, %1, %111 : vector<8x128xi32>
    %113 = vector.extract_strided_slice %0 {offsets = [0, 18], sizes = [8, 1], strides = [1, 1]} : vector<8x128xf32> to vector<8x1xf32>
    %114 = vector.shape_cast %113 : vector<8x1xf32> to vector<8x1xf32>
    %115 = vector.broadcast %114 : vector<8x1xf32> to vector<8x128xf32>
    %116 = arith.select %112, %115, %110 : vector<8x128xi1>, vector<8x128xf32>
    %c19_i32 = arith.constant 19 : i32
    %117 = vector.broadcast %c19_i32 : i32 to vector<8x128xi32>
    %118 = arith.cmpi eq, %1, %117 : vector<8x128xi32>
    %119 = vector.extract_strided_slice %0 {offsets = [0, 19], sizes = [8, 1], strides = [1, 1]} : vector<8x128xf32> to vector<8x1xf32>
    %120 = vector.shape_cast %119 : vector<8x1xf32> to vector<8x1xf32>
    %121 = vector.broadcast %120 : vector<8x1xf32> to vector<8x128xf32>
    %122 = arith.select %118, %121, %116 : vector<8x128xi1>, vector<8x128xf32>
    %c20_i32 = arith.constant 20 : i32
    %123 = vector.broadcast %c20_i32 : i32 to vector<8x128xi32>
    %124 = arith.cmpi eq, %1, %123 : vector<8x128xi32>
    %125 = vector.extract_strided_slice %0 {offsets = [0, 20], sizes = [8, 1], strides = [1, 1]} : vector<8x128xf32> to vector<8x1xf32>
    %126 = vector.shape_cast %125 : vector<8x1xf32> to vector<8x1xf32>
    %127 = vector.broadcast %126 : vector<8x1xf32> to vector<8x128xf32>
    %128 = arith.select %124, %127, %122 : vector<8x128xi1>, vector<8x128xf32>
    %c21_i32 = arith.constant 21 : i32
    %129 = vector.broadcast %c21_i32 : i32 to vector<8x128xi32>
    %130 = arith.cmpi eq, %1, %129 : vector<8x128xi32>
    %131 = vector.extract_strided_slice %0 {offsets = [0, 21], sizes = [8, 1], strides = [1, 1]} : vector<8x128xf32> to vector<8x1xf32>
    %132 = vector.shape_cast %131 : vector<8x1xf32> to vector<8x1xf32>
    %133 = vector.broadcast %132 : vector<8x1xf32> to vector<8x128xf32>
    %134 = arith.select %130, %133, %128 : vector<8x128xi1>, vector<8x128xf32>
    %c22_i32 = arith.constant 22 : i32
    %135 = vector.broadcast %c22_i32 : i32 to vector<8x128xi32>
    %136 = arith.cmpi eq, %1, %135 : vector<8x128xi32>
    %137 = vector.extract_strided_slice %0 {offsets = [0, 22], sizes = [8, 1], strides = [1, 1]} : vector<8x128xf32> to vector<8x1xf32>
    %138 = vector.shape_cast %137 : vector<8x1xf32> to vector<8x1xf32>
    %139 = vector.broadcast %138 : vector<8x1xf32> to vector<8x128xf32>
    %140 = arith.select %136, %139, %134 : vector<8x128xi1>, vector<8x128xf32>
    %c23_i32 = arith.constant 23 : i32
    %141 = vector.broadcast %c23_i32 : i32 to vector<8x128xi32>
    %142 = arith.cmpi eq, %1, %141 : vector<8x128xi32>
    %143 = vector.extract_strided_slice %0 {offsets = [0, 23], sizes = [8, 1], strides = [1, 1]} : vector<8x128xf32> to vector<8x1xf32>
    %144 = vector.shape_cast %143 : vector<8x1xf32> to vector<8x1xf32>
    %145 = vector.broadcast %144 : vector<8x1xf32> to vector<8x128xf32>
    %146 = arith.select %142, %145, %140 : vector<8x128xi1>, vector<8x128xf32>
    %c24_i32 = arith.constant 24 : i32
    %147 = vector.broadcast %c24_i32 : i32 to vector<8x128xi32>
    %148 = arith.cmpi eq, %1, %147 : vector<8x128xi32>
    %149 = vector.extract_strided_slice %0 {offsets = [0, 24], sizes = [8, 1], strides = [1, 1]} : vector<8x128xf32> to vector<8x1xf32>
    %150 = vector.shape_cast %149 : vector<8x1xf32> to vector<8x1xf32>
    %151 = vector.broadcast %150 : vector<8x1xf32> to vector<8x128xf32>
    %152 = arith.select %148, %151, %146 : vector<8x128xi1>, vector<8x128xf32>
    %c25_i32 = arith.constant 25 : i32
    %153 = vector.broadcast %c25_i32 : i32 to vector<8x128xi32>
    %154 = arith.cmpi eq, %1, %153 : vector<8x128xi32>
    %155 = vector.extract_strided_slice %0 {offsets = [0, 25], sizes = [8, 1], strides = [1, 1]} : vector<8x128xf32> to vector<8x1xf32>
    %156 = vector.shape_cast %155 : vector<8x1xf32> to vector<8x1xf32>
    %157 = vector.broadcast %156 : vector<8x1xf32> to vector<8x128xf32>
    %158 = arith.select %154, %157, %152 : vector<8x128xi1>, vector<8x128xf32>
    %c26_i32 = arith.constant 26 : i32
    %159 = vector.broadcast %c26_i32 : i32 to vector<8x128xi32>
    %160 = arith.cmpi eq, %1, %159 : vector<8x128xi32>
    %161 = vector.extract_strided_slice %0 {offsets = [0, 26], sizes = [8, 1], strides = [1, 1]} : vector<8x128xf32> to vector<8x1xf32>
    %162 = vector.shape_cast %161 : vector<8x1xf32> to vector<8x1xf32>
    %163 = vector.broadcast %162 : vector<8x1xf32> to vector<8x128xf32>
    %164 = arith.select %160, %163, %158 : vector<8x128xi1>, vector<8x128xf32>
    %c27_i32 = arith.constant 27 : i32
    %165 = vector.broadcast %c27_i32 : i32 to vector<8x128xi32>
    %166 = arith.cmpi eq, %1, %165 : vector<8x128xi32>
    %167 = vector.extract_strided_slice %0 {offsets = [0, 27], sizes = [8, 1], strides = [1, 1]} : vector<8x128xf32> to vector<8x1xf32>
    %168 = vector.shape_cast %167 : vector<8x1xf32> to vector<8x1xf32>
    %169 = vector.broadcast %168 : vector<8x1xf32> to vector<8x128xf32>
    %170 = arith.select %166, %169, %164 : vector<8x128xi1>, vector<8x128xf32>
    %c28_i32 = arith.constant 28 : i32
    %171 = vector.broadcast %c28_i32 : i32 to vector<8x128xi32>
    %172 = arith.cmpi eq, %1, %171 : vector<8x128xi32>
    %173 = vector.extract_strided_slice %0 {offsets = [0, 28], sizes = [8, 1], strides = [1, 1]} : vector<8x128xf32> to vector<8x1xf32>
    %174 = vector.shape_cast %173 : vector<8x1xf32> to vector<8x1xf32>
    %175 = vector.broadcast %174 : vector<8x1xf32> to vector<8x128xf32>
    %176 = arith.select %172, %175, %170 : vector<8x128xi1>, vector<8x128xf32>
    %c29_i32 = arith.constant 29 : i32
    %177 = vector.broadcast %c29_i32 : i32 to vector<8x128xi32>
    %178 = arith.cmpi eq, %1, %177 : vector<8x128xi32>
    %179 = vector.extract_strided_slice %0 {offsets = [0, 29], sizes = [8, 1], strides = [1, 1]} : vector<8x128xf32> to vector<8x1xf32>
    %180 = vector.shape_cast %179 : vector<8x1xf32> to vector<8x1xf32>
    %181 = vector.broadcast %180 : vector<8x1xf32> to vector<8x128xf32>
    %182 = arith.select %178, %181, %176 : vector<8x128xi1>, vector<8x128xf32>
    %c30_i32 = arith.constant 30 : i32
    %183 = vector.broadcast %c30_i32 : i32 to vector<8x128xi32>
    %184 = arith.cmpi eq, %1, %183 : vector<8x128xi32>
    %185 = vector.extract_strided_slice %0 {offsets = [0, 30], sizes = [8, 1], strides = [1, 1]} : vector<8x128xf32> to vector<8x1xf32>
    %186 = vector.shape_cast %185 : vector<8x1xf32> to vector<8x1xf32>
    %187 = vector.broadcast %186 : vector<8x1xf32> to vector<8x128xf32>
    %188 = arith.select %184, %187, %182 : vector<8x128xi1>, vector<8x128xf32>
    %c31_i32 = arith.constant 31 : i32
    %189 = vector.broadcast %c31_i32 : i32 to vector<8x128xi32>
    %190 = arith.cmpi eq, %1, %189 : vector<8x128xi32>
    %191 = vector.extract_strided_slice %0 {offsets = [0, 31], sizes = [8, 1], strides = [1, 1]} : vector<8x128xf32> to vector<8x1xf32>
    %192 = vector.shape_cast %191 : vector<8x1xf32> to vector<8x1xf32>
    %193 = vector.broadcast %192 : vector<8x1xf32> to vector<8x128xf32>
    %194 = arith.select %190, %193, %188 : vector<8x128xi1>, vector<8x128xf32>
    %c0_3 = arith.constant 0 : index
    %c0_4 = arith.constant 0 : index
    %195 = vector.load %arg3[%c0_3, %c0_4] : memref<8x128xf32, #tpu.memory_space<vmem>>, vector<8x128xf32>
    tpu.vector_store %arg3[%c0_3, %c0_4], %194 {strides = array<i32>} : memref<8x128xf32, #tpu.memory_space<vmem>>, vector<8x128xf32>,
    return
  }
  func.func @transform_0(%arg0: i32) -> (i32, i32) {
    %c0_i32 = arith.constant 0 : i32
    %c0_i32_0 = arith.constant 0 : i32
    return %arg0, %c0_i32 : i32, i32
  }
  func.func @transform_1(%arg0: i32) -> (i32, i32) {
    %c0_i32 = arith.constant 0 : i32
    %c0_i32_0 = arith.constant 0 : i32
    return %arg0, %c0_i32 : i32, i32
  }
  func.func @transform_2(%arg0: i32) -> (i32, i32) {
    %c0_i32 = arith.constant 0 : i32
    %c0_i32_0 = arith.constant 0 : i32
    return %arg0, %c0_i32 : i32, i32
  }
}

</mosaic_0001>

<bundles_post_ra>
// kernel: tpu_custom_call.1
= control target key start
LH: loop header
LB: loop body
LE: loop exit
PB: predicated region body
PF: predicated region fallthrough
CT: control target
= control target key end

     0   :  { %7 = vsyncpa [#allocation3], 0  ;;  %s509_s0 = inlined_call_operand.hbm [shape: f32[8,128], index: 0, kind: input, shape index: {}]   ;;  %s510_s1 = inlined_call_operand.hbm [shape: s32[8,128], index: 1, kind: input, shape index: {}]   ;;  %s511_s2 = inlined_call_operand.hbm [shape: f32[8,128], index: 2, kind: output, shape index: {}]  }
   0x1   :  { %8 = vsyncpa [#allocation6], 0 }
   0x2   :  { %9 = vsyncpa [#allocation4], 0  ;;  %s382_s9 = smov [#allocation2]   ;;  %s383_s11 = smov [#allocation5]  }
   0x3   :  { %s16_s10 = sshll.u32 %s382_s9, 4  ;;  %s26_s12 = sshll.u32 %s383_s11, 4  ;;  %s17_s10 = int_to_ptr.vmem [resolvable:$true] %s16_s10  ;;  %s27_s12 = int_to_ptr.vmem [resolvable:$true] %s26_s12 }
   0x4   :  { %s324_s13 = scalar_lea.vmem %s17_s10, 128  ;;  %p329_p1 = scmp.lt.s32.totalorder %s17_s10, %s17_s10 }
   0x5   :  { %p325_p0 = scmp.ne.s32.totalorder %s17_s10, %s324_s13  ;;  %p330_p2 = scmp.lt.s32.totalorder %s324_s13, %s324_s13 }
   0x7   :  { %p331_p3 = por %p330_p2, %p329_p1 }
   0x9   :  { %p332_p4 = pnand %p331_p3, %p325_p0 }
   0xb   :  { %335 = shalt.err (!%p332_p4)
}
   0xc   :  { %19 = dma.hbm_to_vmem [thread:$0]  %s509_s0, 128, %s17_s10, [#allocation3]  }
   0xd   :  { %s344_s16 = scalar_lea.vmem %s27_s12, 128  ;;  %p349_p6 = scmp.lt.s32.totalorder %s27_s12, %s27_s12 }
   0xe   :  { %p345_p5 = scmp.ne.s32.totalorder %s27_s12, %s344_s16  ;;  %p350_p7 = scmp.lt.s32.totalorder %s344_s16, %s344_s16 }
  0x10   :  { %p351_p8 = por %p350_p7, %p349_p6 }
  0x12   :  { %p352_p9 = pnand %p351_p8, %p345_p5 }
  0x14   :  { %355 = shalt.err (!%p352_p9)
}
  0x15   :  { %29 = dma.hbm_to_vmem [thread:$0]  %s510_s1, 128, %s27_s12, [#allocation6]  }
  0x16   :  { %376 = dma.done.wait [#allocation3], 128  }
  0x17   :  { %377 = vsyncadd [#allocation3], 4294967168 }
  0x18   :  { %378 = dma.done.wait [#allocation6], 128  }
  0x19   :  { %379 = vsyncadd [#allocation6], 4294967168  ;;  %v384_v0 = vmov 2   ;;  %v385_v1 = vmov 0   ;;  %v438_v2 = vld [vmem:[#allocation2] sm:$0xff]  ;;  %v386_v3 = vmov 3  }
  0x1a   :  { %285 = vset.pattern.permute.xlu1 %v384_v0  ;;  %283 = vset.pattern.permute.xlu0 %v385_v1  ;;  %v387_v4 = vmov 1   ;;  %v388_v5 = vmov 4   ;;  %v389_v6 = vmov 5   ;;  %v390_v7 = vmov 6   ;;  %v472_v41 = vld [vmem:[#allocation5] sm:$0xff]  ;;  %s416_s0 = smov [#allocation7]  }
  0x1b   :  { %53 = vperm.xlu1 %285, %v438_v2   ;;  %41 = vperm.xlu0 %283, %v438_v2   ;;  %v391_v8 = vmov 8   ;;  %v392_v9 = vmov 7   ;;  %v393_v10 = vmov 11   ;;  %v394_v11 = vmov 9   ;;  %s238_s1 = sshll.u32 %s416_s0, 4  ;;  %s239_s1 = int_to_ptr.vmem [resolvable:$true] %s238_s1 }
  0x1c   :  { %v395_v12 = vmov 14   ;;  %v396_v13 = vmov 10   ;;  %v397_v14 = vmov 17   ;;  %v398_v15 = vmov 12   ;;  %s356_s19 = scalar_lea.vmem %s239_s1, 128  ;;  %p361_p11 = scmp.lt.s32.totalorder %s239_s1, %s239_s1 }
  0x1d   :  { %v399_v16 = vmov 20   ;;  %v400_v17 = vmov 13   ;;  %v401_v18 = vmov 23   ;;  %v402_v19 = vmov 15   ;;  %p357_p10 = scmp.ne.s32.totalorder %s239_s1, %s356_s19  ;;  %p362_p12 = scmp.lt.s32.totalorder %s356_s19, %s356_s19 }
  0x1e   :  { %v403_v20 = vmov 26   ;;  %v404_v21 = vmov 16   ;;  %v405_v22 = vmov 29   ;;  %v406_v23 = vmov 18  }
  0x1f   :  { %286 = vset.pattern.permute.xlu1 %v386_v3  ;;  %284 = vset.pattern.permute.xlu0 %v387_v4  ;;  %v407_v24 = vmov 31   ;;  %v408_v25 = vmov 19   ;;  %v409_v26 = vmov 21   ;;  %v410_v27 = vmov 22   ;;  %p363_p13 = por %p362_p12, %p361_p11 }
  0x20   :  { %59 = vperm.xlu1 %286, %v438_v2   ;;  %47 = vperm.xlu0 %284, %v438_v2   ;;  %v411_v28 = vmov 24   ;;  %v412_v29 = vmov 25   ;;  %v413_v30 = vmov 27   ;;  %v414_v31 = vmov 28  }
  0x21   :  { %v415_v32 = vmov 30   ;;  %vm38_vm0 = vcmp.eq.s32.totalorder %v472_v41, 0  ;;  %vm45_vm1 = vcmp.eq.s32.totalorder %v472_v41, 1  ;;  %vm51_vm2 = vcmp.eq.s32.totalorder %v472_v41, 2  ;;  %p364_p0 = pnand %p363_p13, %p357_p10 }
  0x22   :  { %vm57_vm3 = vcmp.eq.s32.totalorder %v472_v41, 3  ;;  %vm63_vm4 = vcmp.eq.s32.totalorder %v472_v41, 4  ;;  %vm69_vm5 = vcmp.eq.s32.totalorder %v472_v41, 5  ;;  %vm75_vm6 = vcmp.eq.s32.totalorder %v472_v41, 6 }
  0x23   :  { %vm81_vm7 = vcmp.eq.s32.totalorder %v472_v41, 7  ;;  %vm87_vm8 = vcmp.eq.s32.totalorder %v472_v41, 8  ;;  %vm93_vm9 = vcmp.eq.s32.totalorder %v472_v41, 9  ;;  %vm99_vm10 = vcmp.eq.s32.totalorder %v472_v41, 10 }
  0x24   :  { %287 = vset.pattern.permute.xlu1 %v388_v5  ;;  %288 = vset.pattern.permute.xlu0 %v389_v6  ;;  %vm105_vm11 = vcmp.eq.s32.totalorder %v472_v41, 11  ;;  %vm111_vm12 = vcmp.eq.s32.totalorder %v472_v41, 12  ;;  %vm117_vm13 = vcmp.eq.s32.totalorder %v472_v41, 13  ;;  %vm123_vm14 = vcmp.eq.s32.totalorder %v472_v41, 14 }
  0x25   :  { %65 = vperm.xlu1 %287, %v438_v2   ;;  %71 = vperm.xlu0 %288, %v438_v2   ;;  %vm129_vm15 = vcmp.eq.s32.totalorder %v472_v41, 15 }
  0x29   :  { %289 = vset.pattern.permute.xlu1 %v390_v7  ;;  %291 = vset.pattern.permute.xlu0 %v391_v8 }
  0x2a   :  { %77 = vperm.xlu1 %289, %v438_v2   ;;  %89 = vperm.xlu0 %291, %v438_v2  }
  0x2e   :  { %290 = vset.pattern.permute.xlu1 %v392_v9  ;;  %294 = vset.pattern.permute.xlu0 %v393_v10 }
  0x2f   :  { %83 = vperm.xlu1 %290, %v438_v2   ;;  %107 = vperm.xlu0 %294, %v438_v2  }
  0x33   :  { %292 = vset.pattern.permute.xlu1 %v394_v11  ;;  %297 = vset.pattern.permute.xlu0 %v395_v12 }
  0x34   :  { %95 = vperm.xlu1 %292, %v438_v2   ;;  %125 = vperm.xlu0 %297, %v438_v2  }
  0x38   :  { %293 = vset.pattern.permute.xlu1 %v396_v13  ;;  %300 = vset.pattern.permute.xlu0 %v397_v14 }
  0x39   :  { %101 = vperm.xlu1 %293, %v438_v2   ;;  %143 = vperm.xlu0 %300, %v438_v2  }
  0x3d   :  { %295 = vset.pattern.permute.xlu1 %v398_v15  ;;  %303 = vset.pattern.permute.xlu0 %v399_v16 }
  0x3e   :  { %113 = vperm.xlu1 %295, %v438_v2   ;;  %161 = vperm.xlu0 %303, %v438_v2  }
  0x42   :  { %296 = vset.pattern.permute.xlu1 %v400_v17  ;;  %306 = vset.pattern.permute.xlu0 %v401_v18 }
  0x43   :  { %119 = vperm.xlu1 %296, %v438_v2   ;;  %179 = vperm.xlu0 %306, %v438_v2  }
  0x47   :  { %298 = vset.pattern.permute.xlu1 %v402_v19  ;;  %309 = vset.pattern.permute.xlu0 %v403_v20 }
  0x48   :  { %131 = vperm.xlu1 %298, %v438_v2   ;;  %197 = vperm.xlu0 %309, %v438_v2  }
  0x4c   :  { %299 = vset.pattern.permute.xlu1 %v404_v21  ;;  %312 = vset.pattern.permute.xlu0 %v405_v22 }
  0x4d   :  { %137 = vperm.xlu1 %299, %v438_v2   ;;  %215 = vperm.xlu0 %312, %v438_v2  }
  0x51   :  { %301 = vset.pattern.permute.xlu1 %v406_v23  ;;  %315 = vset.pattern.permute.xlu0 %v407_v24 }
  0x52   :  { %149 = vperm.xlu1 %301, %v438_v2  }
  0x56   :  { %302 = vset.pattern.permute.xlu1 %v408_v25 }
  0x57   :  { %155 = vperm.xlu1 %302, %v438_v2  }
  0x5b   :  { %304 = vset.pattern.permute.xlu1 %v409_v26 }
  0x5c   :  { %167 = vperm.xlu1 %304, %v438_v2  }
  0x60   :  { %305 = vset.pattern.permute.xlu1 %v410_v27 }
  0x61   :  { %173 = vperm.xlu1 %305, %v438_v2  }
  0x65   :  { %307 = vset.pattern.permute.xlu1 %v411_v28 }
  0x66   :  { %185 = vperm.xlu1 %307, %v438_v2  }
  0x6a   :  { %308 = vset.pattern.permute.xlu1 %v412_v29 }
  0x6b   :  { %191 = vperm.xlu1 %308, %v438_v2  }
  0x6f   :  { %310 = vset.pattern.permute.xlu1 %v413_v30 }
  0x70   :  { %203 = vperm.xlu1 %310, %v438_v2  }
  0x74   :  { %311 = vset.pattern.permute.xlu1 %v414_v31 }
  0x75   :  { %209 = vperm.xlu1 %311, %v438_v2  }
  0x79   :  { %313 = vset.pattern.permute.xlu1 %v415_v32 }
  0x7a   :  { %221 = vperm.xlu1 %313, %v438_v2  }
  0x7e   :  { %314 = vset.pattern.permute.xlu1 %v407_v24 }
  0x7f   :  { %227 = vperm.xlu1 %314, %v438_v2  }
  0x96   :  { %v54_v33 = vpop.permute.xlu1 %53  ;;  %v42_v42 = vpop.permute.xlu0 %41 }
  0x97   :  { %v44_v45 = vsel %vm38_vm0, %v42_v42, 0.0  ;;  %vm135_vm0 = vcmp.eq.s32.totalorder %v472_v41, 16 }
  0x9b   :  { %v60_v34 = vpop.permute.xlu1 %59  ;;  %v48_v46 = vpop.permute.xlu0 %47 }
  0x9c   :  { %v50_v47 = vsel %vm45_vm1, %v48_v46, %v44_v45  ;;  %vm141_vm1 = vcmp.eq.s32.totalorder %v472_v41, 17 }
  0x9d   :  { %v56_v49 = vsel %vm51_vm2, %v54_v33, %v50_v47  ;;  %vm147_vm2 = vcmp.eq.s32.totalorder %v472_v41, 18 }
  0x9e   :  { %v62_v50 = vsel %vm57_vm3, %v60_v34, %v56_v49  ;;  %vm153_vm3 = vcmp.eq.s32.totalorder %v472_v41, 19 }
  0xa0   :  { %v66_v35 = vpop.permute.xlu1 %65  ;;  %v72_v53 = vpop.permute.xlu0 %71 }
  0xa1   :  { %v68_v52 = vsel %vm63_vm4, %v66_v35, %v62_v50  ;;  %vm159_vm4 = vcmp.eq.s32.totalorder %v472_v41, 20 }
  0xa2   :  { %v74_v54 = vsel %vm69_vm5, %v72_v53, %v68_v52  ;;  %vm165_vm5 = vcmp.eq.s32.totalorder %v472_v41, 21 }
  0xa5   :  { %v78_v36 = vpop.permute.xlu1 %77  ;;  %v90_v58 = vpop.permute.xlu0 %89 }
  0xa6   :  { %v80_v55 = vsel %vm75_vm6, %v78_v36, %v74_v54  ;;  %vm171_vm6 = vcmp.eq.s32.totalorder %v472_v41, 22 }
  0xaa   :  { %v84_v37 = vpop.permute.xlu1 %83  ;;  %v108_v63 = vpop.permute.xlu0 %107 }
  0xab   :  { %v86_v57 = vsel %vm81_vm7, %v84_v37, %v80_v55  ;;  %vm177_vm7 = vcmp.eq.s32.totalorder %v472_v41, 23 }
  0xac   :  { %v92_v59 = vsel %vm87_vm8, %v90_v58, %v86_v57  ;;  %vm183_vm8 = vcmp.eq.s32.totalorder %v472_v41, 24 }
  0xaf   :  { %v96_v38 = vpop.permute.xlu1 %95  ;;  %v126_v4 = vpop.permute.xlu0 %125 }
  0xb0   :  { %v98_v60 = vsel %vm93_vm9, %v96_v38, %v92_v59  ;;  %vm189_vm9 = vcmp.eq.s32.totalorder %v472_v41, 25 }
  0xb4   :  { %v102_v39 = vpop.permute.xlu1 %101  ;;  %v144_v9 = vpop.permute.xlu0 %143 }
  0xb5   :  { %v104_v62 = vsel %vm99_vm10, %v102_v39, %v98_v60  ;;  %vm195_vm10 = vcmp.eq.s32.totalorder %v472_v41, 26 }
  0xb6   :  { %v110_v0 = vsel %vm105_vm11, %v108_v63, %v104_v62  ;;  %vm201_vm11 = vcmp.eq.s32.totalorder %v472_v41, 27 }
  0xb9   :  { %v114_v40 = vpop.permute.xlu1 %113  ;;  %v162_v14 = vpop.permute.xlu0 %161 }
  0xba   :  { %v116_v1 = vsel %vm111_vm12, %v114_v40, %v110_v0  ;;  %vm207_vm12 = vcmp.eq.s32.totalorder %v472_v41, 28 }
  0xbe   :  { %v120_v43 = vpop.permute.xlu1 %119  ;;  %v180_v19 = vpop.permute.xlu0 %179 }
  0xbf   :  { %v122_v3 = vsel %vm117_vm13, %v120_v43, %v116_v1  ;;  %vm213_vm13 = vcmp.eq.s32.totalorder %v472_v41, 29 }
  0xc0   :  { %v128_v5 = vsel %vm123_vm14, %v126_v4, %v122_v3  ;;  %vm219_vm14 = vcmp.eq.s32.totalorder %v472_v41, 30 }
  0xc3   :  { %v132_v44 = vpop.permute.xlu1 %131  ;;  %v198_v24 = vpop.permute.xlu0 %197 }
  0xc4   :  { %v134_v6 = vsel %vm129_vm15, %v132_v44, %v128_v5  ;;  %vm225_vm15 = vcmp.eq.s32.totalorder %v472_v41, 31 }
  0xc8   :  { %v138_v48 = vpop.permute.xlu1 %137  ;;  %v216_v29 = vpop.permute.xlu0 %215 }
  0xc9   :  { %v140_v8 = vsel %vm135_vm0, %v138_v48, %v134_v6 }
  0xca   :  { %v146_v10 = vsel %vm141_vm1, %v144_v9, %v140_v8 }
  0xcd   :  { %v150_v51 = vpop.permute.xlu1 %149 }
  0xce   :  { %v152_v11 = vsel %vm147_vm2, %v150_v51, %v146_v10 }
  0xd2   :  { %v156_v56 = vpop.permute.xlu1 %155 }
  0xd3   :  { %v158_v13 = vsel %vm153_vm3, %v156_v56, %v152_v11 }
  0xd4   :  { %v164_v15 = vsel %vm159_vm4, %v162_v14, %v158_v13 }
  0xd7   :  { %v168_v61 = vpop.permute.xlu1 %167 }
  0xd8   :  { %v170_v16 = vsel %vm165_vm5, %v168_v61, %v164_v15 }
  0xdc   :  { %v174_v2 = vpop.permute.xlu1 %173 }
  0xdd   :  { %v176_v18 = vsel %vm171_vm6, %v174_v2, %v170_v16 }
  0xde   :  { %v182_v20 = vsel %vm177_vm7, %v180_v19, %v176_v18 }
  0xe1   :  { %v186_v7 = vpop.permute.xlu1 %185 }
  0xe2   :  { %v188_v21 = vsel %vm183_vm8, %v186_v7, %v182_v20 }
  0xe6   :  { %v192_v12 = vpop.permute.xlu1 %191 }
  0xe7   :  { %v194_v23 = vsel %vm189_vm9, %v192_v12, %v188_v21 }
  0xe8   :  { %v200_v25 = vsel %vm195_vm10, %v198_v24, %v194_v23 }
  0xeb   :  { %v204_v17 = vpop.permute.xlu1 %203 }
  0xec   :  { %v206_v26 = vsel %vm201_vm11, %v204_v17, %v200_v25 }
  0xf0   :  { %v210_v22 = vpop.permute.xlu1 %209 }
  0xf1   :  { %v212_v28 = vsel %vm207_vm12, %v210_v22, %v206_v26 }
  0xf2   :  { %v218_v30 = vsel %vm213_vm13, %v216_v29, %v212_v28 }
  0xf5   :  { %v222_v27 = vpop.permute.xlu1 %221 }
  0xf6   :  { %v224_v31 = vsel %vm219_vm14, %v222_v27, %v218_v30 }
  0xfa   :  { %v228_v32 = vpop.permute.xlu1 %227 }
  0xfb   :  { %v230_v33 = vsel %vm225_vm15, %v228_v32, %v224_v31 }
  0xfc   :  { %231 = vst [vmem:[#allocation7] sm:$0xff] %v230_v33 }
  0xfd   :  { %367 = shalt.err (!%p364_p0)
}
  0xfe   :  { %241 = dma.vmem_to_hbm [thread:$0]  %s239_s1, 128, %s511_s2, [#allocation4]  }
  0xff   :  { %380 = dma.done.wait [#allocation4], 128  }
 0x100   :  { %381 = vsyncadd [#allocation4], 4294967168 }
 0x101   :  { %245 = vsyncpa [#allocation3], 1 }
 0x102   :  { %246 = vsyncpa [#allocation6], 1 }
 0x103   :  { %247 = vsyncpa [#allocation4], 1 }

</bundles_post_ra>
